<compile_context>
chip_gen: v6e
topology: v6e:2x2x1
jax: 0.10.0
libtpu: 0.0.40
codegen_flags: <defaults>
</compile_context>

<pallas_src>
import jax
import jax.numpy as jnp
import numpy as np
from jax.experimental import pallas as pl
from jax.experimental.pallas import tpu as pltpu


# --------------------------------------------------------------------------------------
# Kernel
# --------------------------------------------------------------------------------------
def hierarchy_gcn_kernel(x_ref, adj_ref, bias_ref, gate_w_ref, gate_b_ref, o_ref):
    # x_ref block: (TB, N, D) — TB batch samples per grid step.
    TB, N, D = x_ref.shape

    # Resident, single-copy parameters (loaded once per grid step, loop-invariant).
    adj = adj_ref[...].astype(jnp.float32)        # (2N, N): rows [0:N)=A_in, [N:2N)=A_out
    bias = bias_ref[...].astype(jnp.float32)      # (2N, D): [bias_in ; bias_out]
    gate_w = gate_w_ref[...].astype(jnp.float32)  # (D, 3):  [w_in | w_out | w_loop]
    gate_b = gate_b_ref[...].astype(jnp.float32)  # (N, 3):  [b_in | b_out | 0]

    def one_sample(t):
        h = x_ref[t].astype(jnp.float32)                                      # (N, D)
        # Fused in/out-arc aggregation: ONE 2-D MXU matmul; adj never broadcast/copied.
        agg = jnp.dot(adj, h, preferred_element_type=jnp.float32)             # (2N, D)
        # All three gates with one small 2-D matmul (sigmoid rides the free EUP slot).
        g = jnp.dot(h, gate_w, preferred_element_type=jnp.float32) + gate_b   # (N, 3)
        s = jax.nn.sigmoid(g)
        # Gated message fuse + ReLU.  The (N,1)->(N,D) lane broadcasts are intentionally
        # left implicit (the broadcast path has slack; materializing them would only add
        # VMEM temps and store traffic).
        msg = ((agg[:N] + bias[:N]) * s[:, 0:1]       # in-arc  (children aggregation)
               + (agg[N:] + bias[N:]) * s[:, 1:2]     # out-arc (parent broadcast)
               + h * s[:, 2:3])                       # self loop
        # TODO(synk): training-mode dropout on each message is identity at eval time and
        # is intentionally omitted (would need pltpu.prng_seed + stateful_bernoulli).
        o_ref[t] = jnp.maximum(msg, 0.0).astype(o_ref.dtype)

    if TB <= 8:
        for t in range(TB):            # short static loop -> fully unrolled, LLO-visible
            one_sample(t)
    else:
        @pl.loop(0, TB)
        def _(t):
            one_sample(t)


# --------------------------------------------------------------------------------------
# Generation-aware tiling / VMEM helpers
# --------------------------------------------------------------------------------------
def _tpu_meta():
    """Best-effort hardware query: #TensorCores per chip, physical VMEM, block target."""
    kind = ""
    try:
        kind = jax.devices()[0].device_kind.lower()
    except Exception:
        pass
    vmem_phys = 64 << 20          # conservative default = v7x per-core physical VMEM
    try:
        vmem_phys = int(getattr(pltpu.get_tpu_info(), "vmem_capacity_bytes", vmem_phys))
    except Exception:
        pass
    num_cores = 2 if ("v7" in kind or "7x" in kind) else 1   # v5e/v6e: 1 TC per chip
    # x-block size target: ~6 MiB on 128-MiB-VMEM chips, ~3.5 MiB on 64-MiB v7x.
    target = (7 << 19) if num_cores == 2 else (6 << 20)
    return {"device_kind": kind, "num_cores": num_cores,
            "vmem_phys_bytes": vmem_phys, "target_block_bytes": target}


def _pick_batch_tile(B, N, D, num_cores, target_bytes):
    """Largest divisor of B whose (TB,N,D) f32 block fits the target.

    1-TC chips (v5e/v6e): prefer a single grid step (the grid is a serial loop; each
    extra step is ~0.35 us of pure pipeline overhead).  v7x megacore: prefer >=2 steps
    per core so both cores get work AND each keeps double-buffered DMA overlap."""
    divs = [t for t in range(1, B + 1) if B % t == 0]
    fit = [t for t in divs if t * N * D * 4 <= target_bytes] or [1]
    if num_cores <= 1:
        return max(fit)
    for min_steps in (2 * num_cores, num_cores):
        cand = [t for t in fit if B // t >= min_steps]
        if cand:
            return max(cand)
    return max(fit)


def _const_spec(shape):
    """BlockSpec for a grid-invariant (resident) parameter; single-buffered when the
    installed Pallas supports pipeline_mode (its index never changes, so a second
    buffer would only waste VMEM — the adjacency alone is O(N^2))."""
    index_map = lambda *_: (0,) * len(shape)
    buffered = getattr(pl, "Buffered", None)
    if buffered is not None:
        try:
            return pl.BlockSpec(shape, index_map, pipeline_mode=buffered(1))
        except TypeError:
            pass
    return pl.BlockSpec(shape, index_map)


# --------------------------------------------------------------------------------------
# Wrapper
# --------------------------------------------------------------------------------------
def hierarchy_gcn_forward(x, params):
    """x: (B, N, D) float32. params: dict of raw GCN parameters (fused here, wrapper-side)."""
    B, N, D = x.shape
    meta = _tpu_meta()
    TB = _pick_batch_tile(B, N, D, meta["num_cores"], meta["target_block_bytes"])
    grid = (B // TB,)

    # ---- wrapper-side parameter fusion (constants; pure layout plumbing) ------------
    adj_cat = jnp.concatenate([params["adj_in"], params["adj_out"]], axis=0)      # (2N, N)
    bias_cat = jnp.concatenate([params["bias_in"], params["bias_out"]], axis=0)   # (2N, D)
    gate_w = jnp.concatenate([params["gate_w_in"], params["gate_w_out"],
                              params["gate_w_loop"]], axis=0).T                   # (D, 3)
    gate_b = jnp.concatenate([params["gate_b_in"], params["gate_b_out"],
                              jnp.zeros((N, 1), jnp.float32)], axis=1)            # (N, 3)

    # ---- cost hint for XLA's scheduler -----------------------------------------------
    flops = int(B * (2 * (2 * N) * N * D      # fused adjacency matmul
                     + 2 * N * D * 3          # gate matmul
                     + 10 * N * D))           # elementwise fuse
    transcendentals = int(3 * B * N)          # sigmoids
    param_elems = 2 * N * N + 2 * N * D + 3 * D + 3 * N
    bytes_accessed = int((2 * B * N * D + param_elems) * 4)

    # ---- VMEM budget: 2x in + 2x out double buffers, single-buffered params, temps ---
    block_bytes = TB * N * D * 4
    param_bytes = param_elems * 4
    vmem_needed = 4 * block_bytes + param_bytes + 4 * N * D * 4 + (2 << 20)  # incl. headroom
    vmem_cap = min(48 << 20, int(0.75 * meta["vmem_phys_bytes"]))
    vmem_limit = None if vmem_needed <= (12 << 20) else int(min(vmem_needed, vmem_cap))

    return pl.pallas_call(
        hierarchy_gcn_kernel,
        out_shape=jax.ShapeDtypeStruct((B, N, D), x.dtype),
        grid_spec=pltpu.PrefetchScalarGridSpec(
            num_scalar_prefetch=0,
            grid=grid,
            in_specs=[
                pl.BlockSpec((TB, N, D), lambda i: (i, 0, 0)),   # x (batch tile)
                _const_spec((2 * N, N)),                         # fused adjacency (resident)
                _const_spec((2 * N, D)),                         # fused edge biases (resident)
                _const_spec((D, 3)),                             # fused gate weights (resident)
                _const_spec((N, 3)),                             # fused gate biases (resident)
            ],
            out_specs=pl.BlockSpec((TB, N, D), lambda i: (i, 0, 0)),
        ),
        compiler_params=pltpu.CompilerParams(
            dimension_semantics=("parallel",),
            vmem_limit_bytes=vmem_limit),
        cost_estimate=pl.CostEstimate(
            flops=flops,
            transcendentals=transcendentals,
            bytes_accessed=bytes_accessed),
    )(x, adj_cat, bias_cat, gate_w, gate_b)


# --------------------------------------------------------------------------------------
# Pure-JAX reference + deterministic parameter construction
# --------------------------------------------------------------------------------------
def reference_forward(x, p):
    """Pure-JAX reference of the same HierarchyGCN step (for validation)."""
    h = x.astype(jnp.float32)
    h_in = jnp.einsum('ij,bjd->bid', p["adj_in"], h)
    g_in = jnp.einsum('bnd,d->bn', h, p["gate_w_in"][0])[..., None] + p["gate_b_in"]
    msg = (h_in + p["bias_in"]) * jax.nn.sigmoid(g_in)
    h_out = jnp.einsum('ij,bjd->bid', p["adj_out"], h)
    g_out = jnp.einsum('bnd,d->bn', h, p["gate_w_out"][0])[..., None] + p["gate_b_out"]
    msg = msg + (h_out + p["bias_out"]) * jax.nn.sigmoid(g_out)
    g_loop = jnp.einsum('bnd,d->bn', h, p["gate_w_loop"][0])[..., None]
    msg = msg + h * jax.nn.sigmoid(g_loop)
    return jax.nn.relu(msg)


def build_params(num_nodes, in_dim, key):
    """Deterministically build hierarchy matrices + GCN parameters.

    Mirrors StructureEncoder.__init__: node_prob_from_child / node_prob_from_parent are
    built from a (synthetic, in-script) label hierarchy; HierarchyGCN then multiplies
    them by the 0/1 origin mask (identical support, so mask*adj == adj here)."""
    # synthetic hierarchy: node 0 is root-level, node i's parent is (i-1)//2 (binary tree)
    node_prob_from_parent = np.zeros((num_nodes, num_nodes), dtype=np.float32)
    node_prob_from_child = np.zeros((num_nodes, num_nodes), dtype=np.float32)
    rng = np.random.RandomState(0)
    for c in range(1, num_nodes):
        p_node = (c - 1) // 2
        prob = float(rng.uniform(0.2, 1.0))              # P(child | parent)
        node_prob_from_parent[c, p_node] = prob
        node_prob_from_child[p_node, c] = 1.0

    keys = jax.random.split(key, 7)
    scale = 0.1
    params = {
        # in_matrix -> bottom-up adjacency, out_matrix -> top-down adjacency
        "adj_in": jnp.asarray(node_prob_from_child),
        "adj_out": jnp.asarray(node_prob_from_parent),
        "bias_in": scale * jax.random.normal(keys[0], (num_nodes, in_dim), jnp.float32),
        "bias_out": scale * jax.random.normal(keys[1], (num_nodes, in_dim), jnp.float32),
        "gate_w_in": scale * jax.random.normal(keys[2], (1, in_dim), jnp.float32),
        "gate_w_out": scale * jax.random.normal(keys[3], (1, in_dim), jnp.float32),
        "gate_w_loop": scale * jax.random.normal(keys[4], (1, in_dim), jnp.float32),
        "gate_b_in": scale * jax.random.normal(keys[5], (num_nodes, 1), jnp.float32),
        "gate_b_out": scale * jax.random.normal(keys[6], (num_nodes, 1), jnp.float32),
    }
    return params


if __name__ == "__main__":
    # batch, num label nodes, gcn node dimension (D multiple of 128 -> lane-dense blocks)
    B, N, D = 4, 16, 128
    key = jax.random.PRNGKey(0)
    k_x, k_p = jax.random.split(key)

    x = jax.random.normal(k_x, (B, N, D), jnp.float32)
    params = build_params(N, D, k_p)

    out = hierarchy_gcn_forward(x, params)
    out = jax.block_until_ready(out)

    ref = reference_forward(x, params)
    np.testing.assert_allclose(np.asarray(out), np.asarray(ref), rtol=1e-4, atol=1e-4)

    print("KERNEL_OK")
</pallas_src>

<mosaic_0001>
module attributes {stable_mosaic.version = 11 : i64} {
  func.func @hierarchy_gcn_kernel(%arg0: i32, %arg1: memref<4x16x128xf32, #tpu.memory_space<vmem>>, %arg2: memref<32x16xf32, #tpu.memory_space<vmem>>, %arg3: memref<32x128xf32, #tpu.memory_space<vmem>>, %arg4: memref<128x3xf32, #tpu.memory_space<vmem>>, %arg5: memref<16x3xf32, #tpu.memory_space<vmem>>, %arg6: memref<4x16x128xf32, #tpu.memory_space<vmem>>) attributes {dimension_semantics = [#tpu.dimension_semantics<parallel>], iteration_bounds = array<i64: 1>, scalar_prefetch = 0 : i64, scratch_operands = 0 : i64, tpu.core_type = #tpu.core_type<tc>, window_params = [{transform_indices = @transform_0, window_bounds = array<i64: 4, 16, 128>}, {pipeline_mode = #tpu.pipeline_mode<synchronous>, transform_indices = @transform_1, window_bounds = array<i64: 32, 16>}, {pipeline_mode = #tpu.pipeline_mode<synchronous>, transform_indices = @transform_2, window_bounds = array<i64: 32, 128>}, {pipeline_mode = #tpu.pipeline_mode<synchronous>, transform_indices = @transform_3, window_bounds = array<i64: 128, 3>}, {pipeline_mode = #tpu.pipeline_mode<synchronous>, transform_indices = @transform_4, window_bounds = array<i64: 16, 3>}, {transform_indices = @transform_5, window_bounds = array<i64: 4, 16, 128>}]} {
    %c0 = arith.constant 0 : index
    %c0_0 = arith.constant 0 : index
    %0 = vector.load %arg2[%c0, %c0_0] : memref<32x16xf32, #tpu.memory_space<vmem>>, vector<32x16xf32>
    %c0_1 = arith.constant 0 : index
    %c0_2 = arith.constant 0 : index
    %1 = vector.load %arg3[%c0_1, %c0_2] : memref<32x128xf32, #tpu.memory_space<vmem>>, vector<32x128xf32>
    %c0_3 = arith.constant 0 : index
    %c0_4 = arith.constant 0 : index
    %2 = vector.load %arg4[%c0_3, %c0_4] : memref<128x3xf32, #tpu.memory_space<vmem>>, vector<128x3xf32>
    %c0_5 = arith.constant 0 : index
    %c0_6 = arith.constant 0 : index
    %3 = vector.load %arg5[%c0_5, %c0_6] : memref<16x3xf32, #tpu.memory_space<vmem>>, vector<16x3xf32>
    %c0_7 = arith.constant 0 : index
    %c0_8 = arith.constant 0 : index
    %c0_9 = arith.constant 0 : index
    %4 = vector.load %arg1[%c0_7, %c0_8, %c0_9] : memref<4x16x128xf32, #tpu.memory_space<vmem>>, vector<1x16x128xf32>
    %5 = vector.shape_cast %4 : vector<1x16x128xf32> to vector<16x128xf32>
    %cst = arith.constant dense<0.000000e+00> : vector<32x128xf32>
    %6 = tpu.matmul %0, %5, %cst {dimension_numbers = #tpu.dot_dimension_numbers<[1], [0], [0], [1], [0, 0, 1, 1], [], []>} : vector<32x16xf32>, vector<16x128xf32>, vector<32x128xf32> -> vector<32x128xf32>
    %cst_10 = arith.constant dense<0.000000e+00> : vector<16x3xf32>
    %7 = tpu.matmul %5, %2, %cst_10 {dimension_numbers = #tpu.dot_dimension_numbers<[1], [0], [0], [1], [0, 0, 1, 1], [], []>} : vector<16x128xf32>, vector<128x3xf32>, vector<16x3xf32> -> vector<16x3xf32>
    %8 = arith.addf %7, %3 : vector<16x3xf32>
    %9 = arith.negf %8 : vector<16x3xf32>
    %10 = math.exp %9 : vector<16x3xf32>
    %cst_11 = arith.constant 1.000000e+00 : f32
    %11 = vector.broadcast %cst_11 : f32 to vector<16x3xf32>
    %12 = arith.addf %11, %10 : vector<16x3xf32>
    %13 = arith.divf %11, %12 : vector<16x3xf32>
    %14 = vector.extract_strided_slice %6 {offsets = [0, 0], sizes = [16, 128], strides = [1, 1]} : vector<32x128xf32> to vector<16x128xf32>
    %15 = vector.extract_strided_slice %1 {offsets = [0, 0], sizes = [16, 128], strides = [1, 1]} : vector<32x128xf32> to vector<16x128xf32>
    %16 = arith.addf %14, %15 : vector<16x128xf32>
    %17 = vector.extract_strided_slice %13 {offsets = [0, 0], sizes = [16, 1], strides = [1, 1]} : vector<16x3xf32> to vector<16x1xf32>
    %18 = vector.broadcast %17 : vector<16x1xf32> to vector<16x128xf32>
    %19 = arith.mulf %16, %18 : vector<16x128xf32>
    %20 = vector.extract_strided_slice %6 {offsets = [16, 0], sizes = [16, 128], strides = [1, 1]} : vector<32x128xf32> to vector<16x128xf32>
    %21 = vector.extract_strided_slice %1 {offsets = [16, 0], sizes = [16, 128], strides = [1, 1]} : vector<32x128xf32> to vector<16x128xf32>
    %22 = arith.addf %20, %21 : vector<16x128xf32>
    %23 = vector.extract_strided_slice %13 {offsets = [0, 1], sizes = [16, 1], strides = [1, 1]} : vector<16x3xf32> to vector<16x1xf32>
    %24 = vector.broadcast %23 : vector<16x1xf32> to vector<16x128xf32>
    %25 = arith.mulf %22, %24 : vector<16x128xf32>
    %26 = arith.addf %19, %25 : vector<16x128xf32>
    %27 = vector.extract_strided_slice %13 {offsets = [0, 2], sizes = [16, 1], strides = [1, 1]} : vector<16x3xf32> to vector<16x1xf32>
    %28 = vector.broadcast %27 : vector<16x1xf32> to vector<16x128xf32>
    %29 = arith.mulf %5, %28 : vector<16x128xf32>
    %30 = arith.addf %26, %29 : vector<16x128xf32>
    %cst_12 = arith.constant 0.000000e+00 : f32
    %31 = vector.broadcast %cst_12 : f32 to vector<16x128xf32>
    %32 = arith.maximumf %30, %31 : vector<16x128xf32>
    %c0_13 = arith.constant 0 : index
    %c0_14 = arith.constant 0 : index
    %c0_15 = arith.constant 0 : index
    %33 = vector.load %arg6[%c0_13, %c0_14, %c0_15] : memref<4x16x128xf32, #tpu.memory_space<vmem>>, vector<1x16x128xf32>
    %34 = vector.shape_cast %33 : vector<1x16x128xf32> to vector<16x128xf32>
    %35 = vector.shape_cast %32 : vector<16x128xf32> to vector<1x16x128xf32>
    tpu.vector_store %arg6[%c0_13, %c0_14, %c0_15], %35 {strides = array<i32>} : memref<4x16x128xf32, #tpu.memory_space<vmem>>, vector<1x16x128xf32>,
    %c1 = arith.constant 1 : index
    %c0_16 = arith.constant 0 : index
    %c0_17 = arith.constant 0 : index
    %36 = vector.load %arg1[%c1, %c0_16, %c0_17] : memref<4x16x128xf32, #tpu.memory_space<vmem>>, vector<1x16x128xf32>
    %37 = vector.shape_cast %36 : vector<1x16x128xf32> to vector<16x128xf32>
    %cst_18 = arith.constant dense<0.000000e+00> : vector<32x128xf32>
    %38 = tpu.matmul %0, %37, %cst_18 {dimension_numbers = #tpu.dot_dimension_numbers<[1], [0], [0], [1], [0, 0, 1, 1], [], []>} : vector<32x16xf32>, vector<16x128xf32>, vector<32x128xf32> -> vector<32x128xf32>
    %cst_19 = arith.constant dense<0.000000e+00> : vector<16x3xf32>
    %39 = tpu.matmul %37, %2, %cst_19 {dimension_numbers = #tpu.dot_dimension_numbers<[1], [0], [0], [1], [0, 0, 1, 1], [], []>} : vector<16x128xf32>, vector<128x3xf32>, vector<16x3xf32> -> vector<16x3xf32>
    %40 = arith.addf %39, %3 : vector<16x3xf32>
    %41 = arith.negf %40 : vector<16x3xf32>
    %42 = math.exp %41 : vector<16x3xf32>
    %cst_20 = arith.constant 1.000000e+00 : f32
    %43 = vector.broadcast %cst_20 : f32 to vector<16x3xf32>
    %44 = arith.addf %43, %42 : vector<16x3xf32>
    %45 = arith.divf %43, %44 : vector<16x3xf32>
    %46 = vector.extract_strided_slice %38 {offsets = [0, 0], sizes = [16, 128], strides = [1, 1]} : vector<32x128xf32> to vector<16x128xf32>
    %47 = vector.extract_strided_slice %1 {offsets = [0, 0], sizes = [16, 128], strides = [1, 1]} : vector<32x128xf32> to vector<16x128xf32>
    %48 = arith.addf %46, %47 : vector<16x128xf32>
    %49 = vector.extract_strided_slice %45 {offsets = [0, 0], sizes = [16, 1], strides = [1, 1]} : vector<16x3xf32> to vector<16x1xf32>
    %50 = vector.broadcast %49 : vector<16x1xf32> to vector<16x128xf32>
    %51 = arith.mulf %48, %50 : vector<16x128xf32>
    %52 = vector.extract_strided_slice %38 {offsets = [16, 0], sizes = [16, 128], strides = [1, 1]} : vector<32x128xf32> to vector<16x128xf32>
    %53 = vector.extract_strided_slice %1 {offsets = [16, 0], sizes = [16, 128], strides = [1, 1]} : vector<32x128xf32> to vector<16x128xf32>
    %54 = arith.addf %52, %53 : vector<16x128xf32>
    %55 = vector.extract_strided_slice %45 {offsets = [0, 1], sizes = [16, 1], strides = [1, 1]} : vector<16x3xf32> to vector<16x1xf32>
    %56 = vector.broadcast %55 : vector<16x1xf32> to vector<16x128xf32>
    %57 = arith.mulf %54, %56 : vector<16x128xf32>
    %58 = arith.addf %51, %57 : vector<16x128xf32>
    %59 = vector.extract_strided_slice %45 {offsets = [0, 2], sizes = [16, 1], strides = [1, 1]} : vector<16x3xf32> to vector<16x1xf32>
    %60 = vector.broadcast %59 : vector<16x1xf32> to vector<16x128xf32>
    %61 = arith.mulf %37, %60 : vector<16x128xf32>
    %62 = arith.addf %58, %61 : vector<16x128xf32>
    %cst_21 = arith.constant 0.000000e+00 : f32
    %63 = vector.broadcast %cst_21 : f32 to vector<16x128xf32>
    %64 = arith.maximumf %62, %63 : vector<16x128xf32>
    %c1_22 = arith.constant 1 : index
    %c0_23 = arith.constant 0 : index
    %c0_24 = arith.constant 0 : index
    %65 = vector.load %arg6[%c1_22, %c0_23, %c0_24] : memref<4x16x128xf32, #tpu.memory_space<vmem>>, vector<1x16x128xf32>
    %66 = vector.shape_cast %65 : vector<1x16x128xf32> to vector<16x128xf32>
    %67 = vector.shape_cast %64 : vector<16x128xf32> to vector<1x16x128xf32>
    tpu.vector_store %arg6[%c1_22, %c0_23, %c0_24], %67 {strides = array<i32>} : memref<4x16x128xf32, #tpu.memory_space<vmem>>, vector<1x16x128xf32>,
    %c2 = arith.constant 2 : index
    %c0_25 = arith.constant 0 : index
    %c0_26 = arith.constant 0 : index
    %68 = vector.load %arg1[%c2, %c0_25, %c0_26] : memref<4x16x128xf32, #tpu.memory_space<vmem>>, vector<1x16x128xf32>
    %69 = vector.shape_cast %68 : vector<1x16x128xf32> to vector<16x128xf32>
    %cst_27 = arith.constant dense<0.000000e+00> : vector<32x128xf32>
    %70 = tpu.matmul %0, %69, %cst_27 {dimension_numbers = #tpu.dot_dimension_numbers<[1], [0], [0], [1], [0, 0, 1, 1], [], []>} : vector<32x16xf32>, vector<16x128xf32>, vector<32x128xf32> -> vector<32x128xf32>
    %cst_28 = arith.constant dense<0.000000e+00> : vector<16x3xf32>
    %71 = tpu.matmul %69, %2, %cst_28 {dimension_numbers = #tpu.dot_dimension_numbers<[1], [0], [0], [1], [0, 0, 1, 1], [], []>} : vector<16x128xf32>, vector<128x3xf32>, vector<16x3xf32> -> vector<16x3xf32>
    %72 = arith.addf %71, %3 : vector<16x3xf32>
    %73 = arith.negf %72 : vector<16x3xf32>
    %74 = math.exp %73 : vector<16x3xf32>
    %cst_29 = arith.constant 1.000000e+00 : f32
    %75 = vector.broadcast %cst_29 : f32 to vector<16x3xf32>
    %76 = arith.addf %75, %74 : vector<16x3xf32>
    %77 = arith.divf %75, %76 : vector<16x3xf32>
    %78 = vector.extract_strided_slice %70 {offsets = [0, 0], sizes = [16, 128], strides = [1, 1]} : vector<32x128xf32> to vector<16x128xf32>
    %79 = vector.extract_strided_slice %1 {offsets = [0, 0], sizes = [16, 128], strides = [1, 1]} : vector<32x128xf32> to vector<16x128xf32>
    %80 = arith.addf %78, %79 : vector<16x128xf32>
    %81 = vector.extract_strided_slice %77 {offsets = [0, 0], sizes = [16, 1], strides = [1, 1]} : vector<16x3xf32> to vector<16x1xf32>
    %82 = vector.broadcast %81 : vector<16x1xf32> to vector<16x128xf32>
    %83 = arith.mulf %80, %82 : vector<16x128xf32>
    %84 = vector.extract_strided_slice %70 {offsets = [16, 0], sizes = [16, 128], strides = [1, 1]} : vector<32x128xf32> to vector<16x128xf32>
    %85 = vector.extract_strided_slice %1 {offsets = [16, 0], sizes = [16, 128], strides = [1, 1]} : vector<32x128xf32> to vector<16x128xf32>
    %86 = arith.addf %84, %85 : vector<16x128xf32>
    %87 = vector.extract_strided_slice %77 {offsets = [0, 1], sizes = [16, 1], strides = [1, 1]} : vector<16x3xf32> to vector<16x1xf32>
    %88 = vector.broadcast %87 : vector<16x1xf32> to vector<16x128xf32>
    %89 = arith.mulf %86, %88 : vector<16x128xf32>
    %90 = arith.addf %83, %89 : vector<16x128xf32>
    %91 = vector.extract_strided_slice %77 {offsets = [0, 2], sizes = [16, 1], strides = [1, 1]} : vector<16x3xf32> to vector<16x1xf32>
    %92 = vector.broadcast %91 : vector<16x1xf32> to vector<16x128xf32>
    %93 = arith.mulf %69, %92 : vector<16x128xf32>
    %94 = arith.addf %90, %93 : vector<16x128xf32>
    %cst_30 = arith.constant 0.000000e+00 : f32
    %95 = vector.broadcast %cst_30 : f32 to vector<16x128xf32>
    %96 = arith.maximumf %94, %95 : vector<16x128xf32>
    %c2_31 = arith.constant 2 : index
    %c0_32 = arith.constant 0 : index
    %c0_33 = arith.constant 0 : index
    %97 = vector.load %arg6[%c2_31, %c0_32, %c0_33] : memref<4x16x128xf32, #tpu.memory_space<vmem>>, vector<1x16x128xf32>
    %98 = vector.shape_cast %97 : vector<1x16x128xf32> to vector<16x128xf32>
    %99 = vector.shape_cast %96 : vector<16x128xf32> to vector<1x16x128xf32>
    tpu.vector_store %arg6[%c2_31, %c0_32, %c0_33], %99 {strides = array<i32>} : memref<4x16x128xf32, #tpu.memory_space<vmem>>, vector<1x16x128xf32>,
    %c3 = arith.constant 3 : index
    %c0_34 = arith.constant 0 : index
    %c0_35 = arith.constant 0 : index
    %100 = vector.load %arg1[%c3, %c0_34, %c0_35] : memref<4x16x128xf32, #tpu.memory_space<vmem>>, vector<1x16x128xf32>
    %101 = vector.shape_cast %100 : vector<1x16x128xf32> to vector<16x128xf32>
    %cst_36 = arith.constant dense<0.000000e+00> : vector<32x128xf32>
    %102 = tpu.matmul %0, %101, %cst_36 {dimension_numbers = #tpu.dot_dimension_numbers<[1], [0], [0], [1], [0, 0, 1, 1], [], []>} : vector<32x16xf32>, vector<16x128xf32>, vector<32x128xf32> -> vector<32x128xf32>
    %cst_37 = arith.constant dense<0.000000e+00> : vector<16x3xf32>
    %103 = tpu.matmul %101, %2, %cst_37 {dimension_numbers = #tpu.dot_dimension_numbers<[1], [0], [0], [1], [0, 0, 1, 1], [], []>} : vector<16x128xf32>, vector<128x3xf32>, vector<16x3xf32> -> vector<16x3xf32>
    %104 = arith.addf %103, %3 : vector<16x3xf32>
    %105 = arith.negf %104 : vector<16x3xf32>
    %106 = math.exp %105 : vector<16x3xf32>
    %cst_38 = arith.constant 1.000000e+00 : f32
    %107 = vector.broadcast %cst_38 : f32 to vector<16x3xf32>
    %108 = arith.addf %107, %106 : vector<16x3xf32>
    %109 = arith.divf %107, %108 : vector<16x3xf32>
    %110 = vector.extract_strided_slice %102 {offsets = [0, 0], sizes = [16, 128], strides = [1, 1]} : vector<32x128xf32> to vector<16x128xf32>
    %111 = vector.extract_strided_slice %1 {offsets = [0, 0], sizes = [16, 128], strides = [1, 1]} : vector<32x128xf32> to vector<16x128xf32>
    %112 = arith.addf %110, %111 : vector<16x128xf32>
    %113 = vector.extract_strided_slice %109 {offsets = [0, 0], sizes = [16, 1], strides = [1, 1]} : vector<16x3xf32> to vector<16x1xf32>
    %114 = vector.broadcast %113 : vector<16x1xf32> to vector<16x128xf32>
    %115 = arith.mulf %112, %114 : vector<16x128xf32>
    %116 = vector.extract_strided_slice %102 {offsets = [16, 0], sizes = [16, 128], strides = [1, 1]} : vector<32x128xf32> to vector<16x128xf32>
    %117 = vector.extract_strided_slice %1 {offsets = [16, 0], sizes = [16, 128], strides = [1, 1]} : vector<32x128xf32> to vector<16x128xf32>
    %118 = arith.addf %116, %117 : vector<16x128xf32>
    %119 = vector.extract_strided_slice %109 {offsets = [0, 1], sizes = [16, 1], strides = [1, 1]} : vector<16x3xf32> to vector<16x1xf32>
    %120 = vector.broadcast %119 : vector<16x1xf32> to vector<16x128xf32>
    %121 = arith.mulf %118, %120 : vector<16x128xf32>
    %122 = arith.addf %115, %121 : vector<16x128xf32>
    %123 = vector.extract_strided_slice %109 {offsets = [0, 2], sizes = [16, 1], strides = [1, 1]} : vector<16x3xf32> to vector<16x1xf32>
    %124 = vector.broadcast %123 : vector<16x1xf32> to vector<16x128xf32>
    %125 = arith.mulf %101, %124 : vector<16x128xf32>
    %126 = arith.addf %122, %125 : vector<16x128xf32>
    %cst_39 = arith.constant 0.000000e+00 : f32
    %127 = vector.broadcast %cst_39 : f32 to vector<16x128xf32>
    %128 = arith.maximumf %126, %127 : vector<16x128xf32>
    %c3_40 = arith.constant 3 : index
    %c0_41 = arith.constant 0 : index
    %c0_42 = arith.constant 0 : index
    %129 = vector.load %arg6[%c3_40, %c0_41, %c0_42] : memref<4x16x128xf32, #tpu.memory_space<vmem>>, vector<1x16x128xf32>
    %130 = vector.shape_cast %129 : vector<1x16x128xf32> to vector<16x128xf32>
    %131 = vector.shape_cast %128 : vector<16x128xf32> to vector<1x16x128xf32>
    tpu.vector_store %arg6[%c3_40, %c0_41, %c0_42], %131 {strides = array<i32>} : memref<4x16x128xf32, #tpu.memory_space<vmem>>, vector<1x16x128xf32>,
    return
  }
  func.func @transform_0(%arg0: i32) -> (i32, i32, i32) {
    %c0_i32 = arith.constant 0 : i32
    %c0_i32_0 = arith.constant 0 : i32
    %c0_i32_1 = arith.constant 0 : i32
    return %arg0, %c0_i32, %c0_i32_0 : i32, i32, i32
  }
  func.func @transform_1(%arg0: i32) -> (i32, i32) {
    %c0_i32 = arith.constant 0 : i32
    %c0_i32_0 = arith.constant 0 : i32
    %c0_i32_1 = arith.constant 0 : i32
    return %c0_i32, %c0_i32_0 : i32, i32
  }
  func.func @transform_2(%arg0: i32) -> (i32, i32) {
    %c0_i32 = arith.constant 0 : i32
    %c0_i32_0 = arith.constant 0 : i32
    %c0_i32_1 = arith.constant 0 : i32
    return %c0_i32, %c0_i32_0 : i32, i32
  }
  func.func @transform_3(%arg0: i32) -> (i32, i32) {
    %c0_i32 = arith.constant 0 : i32
    %c0_i32_0 = arith.constant 0 : i32
    %c0_i32_1 = arith.constant 0 : i32
    return %c0_i32, %c0_i32_0 : i32, i32
  }
  func.func @transform_4(%arg0: i32) -> (i32, i32) {
    %c0_i32 = arith.constant 0 : i32
    %c0_i32_0 = arith.constant 0 : i32
    %c0_i32_1 = arith.constant 0 : i32
    return %c0_i32, %c0_i32_0 : i32, i32
  }
  func.func @transform_5(%arg0: i32) -> (i32, i32, i32) {
    %c0_i32 = arith.constant 0 : i32
    %c0_i32_0 = arith.constant 0 : i32
    %c0_i32_1 = arith.constant 0 : i32
    return %arg0, %c0_i32, %c0_i32_0 : i32, i32, i32
  }
}

</mosaic_0001>

<bundles_post_ra>
// kernel: tpu_custom_call.1
= control target key start
LH: loop header
LB: loop body
LE: loop exit
PB: predicated region body
PF: predicated region fallthrough
CT: control target
= control target key end

     0   :  { %vm49_vm0 = vcmask 130048   ;;  %s1795_s0 = inlined_call_operand.vmem [shape: f32[4,16,128], index: 0, kind: input, shape index: {}]   ;;  %s1796_s1 = inlined_call_operand.vmem [shape: f32[32,16], index: 1, kind: input, shape index: {}]   ;;  %s1797_s2 = inlined_call_operand.vmem [shape: f32[32,128], index: 2, kind: input, shape index: {}]   ;;  %s1798_s3 = inlined_call_operand.vmem [shape: f32[128,3], index: 3, kind: input, shape index: {}]   ;;  %s1799_s4 = inlined_call_operand.vmem [shape: f32[16,3], index: 4, kind: input, shape index: {}]   ;;  %s1800_s5 = inlined_call_operand.hbm [shape: f32[4,16,128], index: 5, kind: output, shape index: {}]  }
   0x1   :  { %v1378_v0 = vld [vmem:[%s1795_s0 + $0x8] sm:$0xff]  ;;  %v1383_v1 = vld [vmem:[%s1795_s0 + $0x18] sm:$0xff]  ;;  %v1388_v2 = vld [vmem:[%s1795_s0] sm:$0xff] }
   0x2   :  { %1080 = vmatprep.subr.mxu1 %v1378_v0  ;;  %1125 = vmatprep.subr.mxu0 %v1383_v1  ;;  %v1395_v3 = vld [vmem:[%s1795_s0 + $0x10] sm:$0xff]  ;;  %v1400_v4 = vld [vmem:[%s1796_s1] sm:$0xff]  ;;  %v1407_v5 = vld [vmem:[%s1796_s1 + $0x8] sm:$0xff] }
   0x3   :  { %1081 = vmatpush3.msra.mxu1 %v1378_v0  ;;  %1126 = vmatpush3.msra.mxu0 %v1383_v1  ;;  %v1414_v6 = vld [vmem:[%s1798_s3 + $0x78] sm:$0xff]  ;;  %v1425_v7 = vld [vmem:[%s1798_s3 + $0x70] sm:$0xff]  ;;  %v1435_v8 = vld [vmem:[%s1798_s3 + $0x68] sm:$0xff] }
   0x4   :  { %1082 = vmatprep.subr.mxu1 %v1388_v2  ;;  %1127 = vmatprep.subr.mxu0 %v1395_v3  ;;  %v1445_v9 = vld [vmem:[%s1798_s3 + $0x60] sm:$0xff] }
   0x5   :  { %1083 = vmatpush3.msra.mxu1 %v1388_v2  ;;  %1084 = vmatprep.mubr.msk.f32.mxu1 %vm49_vm0, %v1400_v4 }
   0x6   :  { %1128 = vmatpush3.msra.mxu0 %v1395_v3  ;;  %1085 = vmatmul.mubr.msk.f32.vlgmr.msra.gmra.mxu1 %vm49_vm0, %v1407_v5 }
   0x7   :  { %1090 = vmatprep.subr.mxu1 %v1414_v6  ;;  %1129 = vmatprep.mubr.msk.f32.mxu0 %vm49_vm0, %v1400_v4 }
   0x8   :  { %1135 = vmatprep.subr.mxu0 %v1414_v6  ;;  %1091 = vmatpush3.msra.mxu1 %v1414_v6 }
   0x9   :  { %1130 = vmatmul.mubr.msk.f32.vlgmr.msra.gmra.mxu0 %vm49_vm0, %v1407_v5  ;;  %1092 = vmatprep.subr.mxu1 %v1425_v7 }
   0xa   :  { %1136 = vmatpush3.msra.mxu0 %v1414_v6  ;;  %1093 = vmatpush3.msra.mxu1 %v1425_v7 }
   0xb   :  { %10 = vsyncpa [#allocation3], 0  ;;  %1137 = vmatprep.subr.mxu0 %v1425_v7  ;;  %1094 = vmatprep.subr.mxu1 %v1435_v8  ;;  %v1454_v10 = vld [vmem:[%s1798_s3 + $0x58] sm:$0xff]  ;;  %v1463_v11 = vld [vmem:[%s1798_s3 + $0x50] sm:$0xff]  ;;  %v1339_v28 = vmov 1   ;;  %v1340_v29 = vmov 0  }
   0xc   :  { %1138 = vmatpush3.msra.mxu0 %v1425_v7  ;;  %1095 = vmatpush3.msra.mxu1 %v1435_v8  ;;  %v1472_v12 = vld [vmem:[%s1798_s3 + $0x48] sm:$0xff]  ;;  %v1481_v13 = vld [vmem:[%s1798_s3 + $0x40] sm:$0xff]  ;;  %v1490_v14 = vld [vmem:[%s1798_s3 + $0x38] sm:$0xff] }
   0xd   :  { %1139 = vmatprep.subr.mxu0 %v1435_v8  ;;  %1096 = vmatprep.subr.mxu1 %v1445_v9  ;;  %v1499_v15 = vld [vmem:[%s1798_s3 + $0x30] sm:$0xff]  ;;  %v1508_v16 = vld [vmem:[%s1798_s3 + $0x28] sm:$0xff]  ;;  %v1517_v17 = vld [vmem:[%s1798_s3 + $0x20] sm:$0xff] }
   0xe   :  { %1140 = vmatpush3.msra.mxu0 %v1435_v8  ;;  %1097 = vmatpush3.msra.mxu1 %v1445_v9  ;;  %v1526_v18 = vld [vmem:[%s1798_s3 + $0x18] sm:$0xff]  ;;  %v1535_v19 = vld [vmem:[%s1796_s1 + $0x10] sm:$0xff]  ;;  %v1559_v22 = vld [vmem:[%s1798_s3 + $0x8] sm:$0xff] }
   0xf   :  { %1141 = vmatprep.subr.mxu0 %v1445_v9  ;;  %1098 = vmatprep.subr.mxu1 %v1454_v10  ;;  %v1542_v20 = vld [vmem:[%s1798_s3 + $0x10] sm:$0xff]  ;;  %v1549_v21 = vld [vmem:[%s1796_s1 + $0x18] sm:$0xff]  ;;  %v1569_v23 = vld [vmem:[%s1798_s3] sm:$0xff] }
  0x10   :  { %1142 = vmatpush3.msra.mxu0 %v1445_v9  ;;  %1099 = vmatpush3.msra.mxu1 %v1454_v10  ;;  %v1584_v24 = vld [vmem:[%s1795_s0 + $0x28] sm:$0xff]  ;;  %v1591_v25 = vld [vmem:[%s1795_s0 + $0x38] sm:$0xff]  ;;  %v1600_v26 = vld [vmem:[%s1795_s0 + $0x20] sm:$0xff] }
  0x11   :  { %1143 = vmatprep.subr.mxu0 %v1454_v10  ;;  %1100 = vmatprep.subr.mxu1 %v1463_v11  ;;  %v1605_v27 = vld [vmem:[%s1795_s0 + $0x30] sm:$0xff]  ;;  %v46_v37 = vld [vmem:[%s1799_s4 + $0x8] sm:$0xff]  ;;  %v45_v40 = vld [vmem:[%s1799_s4] sm:$0xff] }
  0x12   :  { %1144 = vmatpush3.msra.mxu0 %v1454_v10  ;;  %1101 = vmatpush3.msra.mxu1 %v1463_v11 }
  0x13   :  { %1145 = vmatprep.subr.mxu0 %v1463_v11  ;;  %1102 = vmatprep.subr.mxu1 %v1472_v12 }
  0x14   :  { %1146 = vmatpush3.msra.mxu0 %v1463_v11  ;;  %1103 = vmatpush3.msra.mxu1 %v1472_v12 }
  0x15   :  { %1147 = vmatprep.subr.mxu0 %v1472_v12  ;;  %1104 = vmatprep.subr.mxu1 %v1481_v13 }
  0x16   :  { %1148 = vmatpush3.msra.mxu0 %v1472_v12  ;;  %1105 = vmatpush3.msra.mxu1 %v1481_v13 }
  0x17   :  { %1149 = vmatprep.subr.mxu0 %v1481_v13  ;;  %1106 = vmatprep.subr.mxu1 %v1490_v14 }
  0x18   :  { %1150 = vmatpush3.msra.mxu0 %v1481_v13  ;;  %1107 = vmatpush3.msra.mxu1 %v1490_v14 }
  0x19   :  { %1151 = vmatprep.subr.mxu0 %v1490_v14  ;;  %1108 = vmatprep.subr.mxu1 %v1499_v15 }
  0x1a   :  { %1152 = vmatpush3.msra.mxu0 %v1490_v14  ;;  %1109 = vmatpush3.msra.mxu1 %v1499_v15 }
  0x1b   :  { %1153 = vmatprep.subr.mxu0 %v1499_v15  ;;  %1110 = vmatprep.subr.mxu1 %v1508_v16 }
  0x1c   :  { %1154 = vmatpush3.msra.mxu0 %v1499_v15  ;;  %1111 = vmatpush3.msra.mxu1 %v1508_v16 }
  0x1d   :  { %1155 = vmatprep.subr.mxu0 %v1508_v16  ;;  %1112 = vmatprep.subr.mxu1 %v1517_v17 }
  0x1e   :  { %1156 = vmatpush3.msra.mxu0 %v1508_v16  ;;  %1113 = vmatpush3.msra.mxu1 %v1517_v17 }
  0x1f   :  { %1157 = vmatprep.subr.mxu0 %v1517_v17  ;;  %1114 = vmatprep.subr.mxu1 %v1526_v18 }
  0x20   :  { %1158 = vmatpush3.msra.mxu0 %v1517_v17  ;;  %1115 = vmatpush3.msra.mxu1 %v1526_v18 }
  0x21   :  { %1159 = vmatprep.subr.mxu0 %v1526_v18  ;;  %1087 = vmatprep.mubr.msk.f32.mxu1 %vm49_vm0, %v1535_v19 }
  0x22   :  { %1160 = vmatpush3.msra.mxu0 %v1526_v18  ;;  %1116 = vmatprep.subr.mxu1 %v1542_v20 }
  0x23   :  { %1161 = vmatprep.subr.mxu0 %v1542_v20  ;;  %1088 = vmatmul.mubr.msk.f32.gmra.mxu1 %vm49_vm0, %v1549_v21 }
  0x24   :  { %1117 = vmatpush3.msra.mxu1 %v1542_v20  ;;  %1162 = vmatpush3.msra.mxu0 %v1542_v20 }
  0x25   :  { %1118 = vmatprep.subr.mxu1 %v1559_v22  ;;  %1132 = vmatprep.mubr.msk.f32.mxu0 %vm49_vm0, %v1535_v19 }
  0x26   :  { %1163 = vmatprep.subr.mxu0 %v1559_v22  ;;  %1119 = vmatpush3.msra.mxu1 %v1559_v22 }
  0x27   :  { %1133 = vmatmul.mubr.msk.f32.gmra.mxu0 %vm49_vm0, %v1549_v21  ;;  %1120 = vmatprep.subr.mxu1 %v1569_v23 }
  0x28   :  { %1164 = vmatpush3.msra.mxu0 %v1559_v22  ;;  %1121 = vmatpush3.msra.mxu1 %v1569_v23 }
  0x29   :  { %1165 = vmatprep.subr.mxu0 %v1569_v23  ;;  %1122 = vmatprep.mubr.f32.mxu1 %v1388_v2 }
  0x2a   :  { %1166 = vmatpush3.msra.mxu0 %v1569_v23  ;;  %1123 = vmatmul.mubr.f32.vlgmr.msra.gmra.mxu1 %v1378_v0 }
  0x2b   :  { %1167 = vmatprep.mubr.f32.mxu0 %v1395_v3  ;;  %1170 = vmatprep.subr.mxu1 %v1584_v24 }
  0x2c   :  { %1215 = vmatprep.subr.mxu0 %v1591_v25  ;;  %1168 = vmatmul.mubr.f32.vlgmr.msra.gmra.mxu0 %v1383_v1 }
  0x2d   :  { %1171 = vmatpush3.msra.mxu1 %v1584_v24  ;;  %1216 = vmatpush3.msra.mxu0 %v1591_v25 }
  0x2e   :  { %1172 = vmatprep.subr.mxu1 %v1600_v26  ;;  %1217 = vmatprep.subr.mxu0 %v1605_v27 }
  0x2f   :  { %1173 = vmatpush3.msra.mxu1 %v1600_v26  ;;  %1174 = vmatprep.mubr.msk.f32.mxu1 %vm49_vm0, %v1400_v4 }
  0x30   :  { %1218 = vmatpush3.msra.mxu0 %v1605_v27  ;;  %1175 = vmatmul.mubr.msk.f32.vlgmr.msra.gmra.mxu1 %vm49_vm0, %v1407_v5 }
  0x31   :  { %1180 = vmatprep.subr.mxu1 %v1414_v6  ;;  %1219 = vmatprep.mubr.msk.f32.mxu0 %vm49_vm0, %v1400_v4 }
  0x32   :  { %1225 = vmatprep.subr.mxu0 %v1414_v6  ;;  %1181 = vmatpush3.msra.mxu1 %v1414_v6 }
  0x33   :  { %1220 = vmatmul.mubr.msk.f32.vlgmr.msra.gmra.mxu0 %vm49_vm0, %v1407_v5  ;;  %1182 = vmatprep.subr.mxu1 %v1425_v7 }
  0x34   :  { %1226 = vmatpush3.msra.mxu0 %v1414_v6  ;;  %1183 = vmatpush3.msra.mxu1 %v1425_v7 }
  0x35   :  { %1227 = vmatprep.subr.mxu0 %v1425_v7  ;;  %1184 = vmatprep.subr.mxu1 %v1435_v8 }
  0x36   :  { %1228 = vmatpush3.msra.mxu0 %v1425_v7  ;;  %1185 = vmatpush3.msra.mxu1 %v1435_v8 }
  0x37   :  { %1229 = vmatprep.subr.mxu0 %v1435_v8  ;;  %1186 = vmatprep.subr.mxu1 %v1445_v9 }
  0x38   :  { %1230 = vmatpush3.msra.mxu0 %v1435_v8  ;;  %1187 = vmatpush3.msra.mxu1 %v1445_v9  ;;  %v1341_v8 = vmov 2  }
  0x39   :  { %1231 = vmatprep.subr.mxu0 %v1445_v9  ;;  %1188 = vmatprep.subr.mxu1 %v1454_v10 }
  0x3a   :  { %1232 = vmatpush3.msra.mxu0 %v1445_v9  ;;  %1189 = vmatpush3.msra.mxu1 %v1454_v10 }
  0x3b   :  { %1233 = vmatprep.subr.mxu0 %v1454_v10  ;;  %1190 = vmatprep.subr.mxu1 %v1463_v11 }
  0x3c   :  { %1234 = vmatpush3.msra.mxu0 %v1454_v10  ;;  %1191 = vmatpush3.msra.mxu1 %v1463_v11 }
  0x3d   :  { %1235 = vmatprep.subr.mxu0 %v1463_v11  ;;  %1192 = vmatprep.subr.mxu1 %v1472_v12 }
  0x3e   :  { %1236 = vmatpush3.msra.mxu0 %v1463_v11  ;;  %1193 = vmatpush3.msra.mxu1 %v1472_v12 }
  0x3f   :  { %1237 = vmatprep.subr.mxu0 %v1472_v12  ;;  %1194 = vmatprep.subr.mxu1 %v1481_v13 }
  0x40   :  { %1238 = vmatpush3.msra.mxu0 %v1472_v12  ;;  %1195 = vmatpush3.msra.mxu1 %v1481_v13 }
  0x41   :  { %1239 = vmatprep.subr.mxu0 %v1481_v13  ;;  %1196 = vmatprep.subr.mxu1 %v1490_v14 }
  0x42   :  { %1240 = vmatpush3.msra.mxu0 %v1481_v13  ;;  %1197 = vmatpush3.msra.mxu1 %v1490_v14 }
  0x43   :  { %1241 = vmatprep.subr.mxu0 %v1490_v14  ;;  %1198 = vmatprep.subr.mxu1 %v1499_v15 }
  0x44   :  { %1242 = vmatpush3.msra.mxu0 %v1490_v14  ;;  %1199 = vmatpush3.msra.mxu1 %v1499_v15 }
  0x45   :  { %1243 = vmatprep.subr.mxu0 %v1499_v15  ;;  %1200 = vmatprep.subr.mxu1 %v1508_v16 }
  0x46   :  { %1244 = vmatpush3.msra.mxu0 %v1499_v15  ;;  %1201 = vmatpush3.msra.mxu1 %v1508_v16 }
  0x47   :  { %1245 = vmatprep.subr.mxu0 %v1508_v16  ;;  %1202 = vmatprep.subr.mxu1 %v1517_v17 }
  0x48   :  { %1246 = vmatpush3.msra.mxu0 %v1508_v16  ;;  %1203 = vmatpush3.msra.mxu1 %v1517_v17 }
  0x49   :  { %1247 = vmatprep.subr.mxu0 %v1517_v17  ;;  %1204 = vmatprep.subr.mxu1 %v1526_v18 }
  0x4a   :  { %1248 = vmatpush3.msra.mxu0 %v1517_v17  ;;  %1177 = vmatprep.mubr.msk.f32.mxu1 %vm49_vm0, %v1535_v19 }
  0x4b   :  { %1249 = vmatprep.subr.mxu0 %v1526_v18  ;;  %1205 = vmatpush3.msra.mxu1 %v1526_v18 }
  0x4c   :  { %1250 = vmatpush3.msra.mxu0 %v1526_v18  ;;  %1178 = vmatmul.mubr.msk.f32.gmra.mxu1 %vm49_vm0, %v1549_v21 }
  0x4d   :  { %1206 = vmatprep.subr.mxu1 %v1542_v20  ;;  %1251 = vmatprep.subr.mxu0 %v1542_v20 }
  0x4e   :  { %1207 = vmatpush3.msra.mxu1 %v1542_v20  ;;  %1222 = vmatprep.mubr.msk.f32.mxu0 %vm49_vm0, %v1535_v19 }
  0x4f   :  { %1252 = vmatpush3.msra.mxu0 %v1542_v20  ;;  %1208 = vmatprep.subr.mxu1 %v1559_v22 }
  0x50   :  { %1223 = vmatmul.mubr.msk.f32.gmra.mxu0 %vm49_vm0, %v1549_v21  ;;  %1253 = vmatprep.subr.mxu0 %v1559_v22 }
  0x51   :  { %1209 = vmatpush3.msra.mxu1 %v1559_v22  ;;  %1254 = vmatpush3.msra.mxu0 %v1559_v22 }
  0x52   :  { %1210 = vmatprep.subr.mxu1 %v1569_v23  ;;  %1255 = vmatprep.subr.mxu0 %v1569_v23 }
  0x53   :  { %1211 = vmatpush3.msra.mxu1 %v1569_v23  ;;  %1212 = vmatprep.mubr.f32.mxu1 %v1600_v26 }
  0x54   :  { %1256 = vmatpush3.msra.mxu0 %v1569_v23  ;;  %1257 = vmatprep.mubr.f32.mxu0 %v1605_v27 }
  0x55   :  { %1213 = vmatmul.mubr.f32.vlgmr.msra.gmra.mxu1 %v1584_v24  ;;  %1258 = vmatmul.mubr.f32.vlgmr.msra.gmra.mxu0 %v1591_v25 }
  0x56   :  { %1267 = vset.pattern.permute.xlu1 %v1339_v28  ;;  %1266 = vset.pattern.permute.xlu0 %v1340_v29 }
  0xc6   :  { %v1701_v30 = vpop.f32.mrf.mxu1 }
  0xc8   :  { %v1703_v31 = vpop.f32.mrf.mxu1 }
  0xc9   :  { %v1705_v32 = vpop.f32.mrf.mxu0 }
  0xcb   :  { %v1709_v34 = vpop.f32.mrf.mxu0 }
  0xe3   :  { %v1707_v33 = vpop.f32.mrf.mxu1 }
  0xe5   :  { %v1711_v35 = vpop.f32.mrf.mxu1 }
  0xe7   :  { %v1713_v36 = vpop.f32.mrf.mxu0 }
  0xe9   :  { %v1718_v38 = vpop.f32.mrf.mxu0 }
  0xea   :  { %v1124_v39 = vpop.f32.mrf.mxu1 }
  0xeb   :  { %v219_v41 = vadd.f32 %v1124_v39, %v46_v37 }
  0xec   :  { %v213_v42 = vpop.f32.mrf.mxu1  ;;  %v1169_v43 = vpop.f32.mrf.mxu0 }
  0xed   :  { %v959_v44 = vmul.f32 -1.442695, %v219_v41  ;;  %v214_v45 = vadd.f32 %v213_v42, %v45_v40  ;;  %v438_v46 = vadd.f32 %v1169_v43, %v46_v37 }
  0xee   :  { %v432_v49 = vpop.f32.mrf.mxu0 }
  0xef   :  { %1285 = vpow2.f32 %v959_v44  ;;  %v958_v47 = vmul.f32 -1.442695, %v214_v45  ;;  %v967_v48 = vmul.f32 -1.442695, %v438_v46  ;;  %v433_v50 = vadd.f32 %v432_v49, %v45_v40 }
  0xf0   :  { %v1723_v59 = vpop.f32.mrf.mxu1 }
  0xf1   :  { %1287 = vpow2.f32 %v967_v48  ;;  %v966_v51 = vmul.f32 -1.442695, %v433_v50 }
  0xf2   :  { %1289 = vpow2.f32 %v958_v47  ;;  %v1727_v63 = vpop.f32.mrf.mxu1 }
  0xf3   :  { %1291 = vpow2.f32 %v966_v51  ;;  %v1725_v60 = vpop.f32.mrf.mxu0  ;;  %v26_v51 = vld [vmem:[%s1797_s2 + $0x8] sm:$0xff] }
  0xf5   :  { %v1729_v4 = vpop.f32.mrf.mxu0 }
  0xfc   :  { %v1286_v52 = vpop.eup %1285 }
  0xfd   :  { %v229_v53 = vadd.f32 1.0, %v1286_v52  ;;  %v235_v52 = vadd.f32 %v1701_v30, %v26_v51 }
  0xfe   :  { %v1288_v54 = vpop.eup %1287 }
  0xff   :  { %1293 = vrcp.f32 %v229_v53  ;;  %v1290_v55 = vpop.eup %1289  ;;  %v448_v56 = vadd.f32 1.0, %v1288_v54 }
 0x100   :  { %v228_v57 = vadd.f32 1.0, %v1290_v55  ;;  %v1292_v58 = vpop.eup %1291 }
 0x101   :  { %1295 = vrcp.f32 %v448_v56  ;;  %v447_v62 = vadd.f32 1.0, %v1292_v58 }
 0x102   :  { %1297 = vrcp.f32 %v228_v57 }
 0x103   :  { %1299 = vrcp.f32 %v447_v62 }
 0x10c   :  { %v1294_v61 = vpop.eup %1293  ;;  %v1731_v6 = vpop.f32.mrf.mxu1 }
 0x10d   :  { %255 = vperm.xlu1 %1267, %v1294_v61   ;;  %243 = vperm.xlu0 %1266, %v1294_v61  }
 0x10e   :  { %v1296_v5 = vpop.eup %1295  ;;  %v1738_v10 = vpop.f32.mrf.mxu1 }
 0x10f   :  { %v1298_v11 = vpop.eup %1297 }
 0x110   :  { %v1733_v7 = vpop.f32.mrf.mxu0  ;;  %v1300_v22 = vpop.eup %1299 }
 0x111   :  { %1268 = vset.pattern.permute.xlu1 %v1341_v8  ;;  %462 = vperm.xlu0 %1266, %v1296_v5  }
 0x112   :  { %v1736_v9 = vpop.f32.mrf.mxu0  ;;  %267 = vperm.xlu1 %1268, %v1294_v61  }
 0x115   :  { %v1214_v12 = vpop.f32.mrf.mxu1  ;;  %v1259_v13 = vpop.f32.mrf.mxu0  ;;  %238 = vperm.xlu0 %1266, %v1298_v11  }
 0x116   :  { %v658_v14 = vadd.f32 %v1214_v12, %v46_v37  ;;  %v878_v15 = vadd.f32 %v1259_v13, %v46_v37  ;;  %1269 = vset.pattern.permute.xlu1 %v1339_v28 }
 0x117   :  { %v652_v16 = vpop.f32.mrf.mxu1  ;;  %474 = vperm.xlu1 %1269, %v1296_v5   ;;  %v872_v20 = vpop.f32.mrf.mxu0 }
 0x118   :  { %v975_v17 = vmul.f32 -1.442695, %v658_v14  ;;  %v983_v18 = vmul.f32 -1.442695, %v878_v15  ;;  %v653_v19 = vadd.f32 %v652_v16, %v45_v40  ;;  %v873_v21 = vadd.f32 %v872_v20, %v45_v40 }
 0x119   :  { %1272 = vset.pattern.permute.xlu0 %v1341_v8 }
 0x11a   :  { %1301 = vpow2.f32 %v975_v17  ;;  %263 = vperm.xlu0 %1272, %v1298_v11   ;;  %v974_v23 = vmul.f32 -1.442695, %v653_v19  ;;  %v982_v37 = vmul.f32 -1.442695, %v873_v21  ;;  %v25_v17 = vld [vmem:[%s1797_s2] sm:$0xff] }
 0x11b   :  { %1303 = vpow2.f32 %v983_v18  ;;  %1270 = vset.pattern.permute.xlu1 %v1341_v8 }
 0x11c   :  { %486 = vperm.xlu1 %1270, %v1296_v5   ;;  %1305 = vpow2.f32 %v974_v23 }
 0x11d   :  { %1307 = vpow2.f32 %v982_v37 }
 0x11e   :  { %482 = vperm.xlu0 %1272, %v1300_v22  }
 0x120   :  { %1271 = vset.pattern.permute.xlu1 %v1339_v28 }
 0x121   :  { %251 = vperm.xlu1 %1271, %v1298_v11  }
 0x122   :  { %1277 = vset.pattern.permute.xlu0 %v1340_v29 }
 0x125   :  { %1273 = vset.pattern.permute.xlu1 %v1340_v29 }
 0x126   :  { %457 = vperm.xlu1 %1273, %v1300_v22  }
 0x127   :  { %v1302_v39 = vpop.eup %1301 }
 0x128   :  { %v1304_v41 = vpop.eup %1303  ;;  %v668_v42 = vadd.f32 1.0, %v1302_v39 }
 0x129   :  { %v888_v43 = vadd.f32 1.0, %v1304_v41  ;;  %v1306_v40 = vpop.eup %1305 }
 0x12a   :  { %1309 = vrcp.f32 %v668_v42  ;;  %1274 = vset.pattern.permute.xlu1 %v1339_v28  ;;  %v1308_v44 = vpop.eup %1307  ;;  %v667_v45 = vadd.f32 1.0, %v1306_v40 }
 0x12b   :  { %1311 = vrcp.f32 %v888_v43  ;;  %470 = vperm.xlu1 %1274, %v1300_v22   ;;  %v887_v46 = vadd.f32 1.0, %v1308_v44  ;;  %v453_v44 = vadd.f32 %v1709_v34, %v25_v17 }
 0x12c   :  { %1313 = vrcp.f32 %v667_v45 }
 0x12d   :  { %1315 = vrcp.f32 %v887_v46 }
 0x12f   :  { %1275 = vset.pattern.permute.xlu1 %v1340_v29 }
 0x137   :  { %v1310_v47 = vpop.eup %1309 }
 0x138   :  { %v1312_v48 = vpop.eup %1311  ;;  %682 = vperm.xlu1 %1275, %v1310_v47  }
 0x139   :  { %902 = vperm.xlu0 %1277, %v1312_v48   ;;  %v1314_v49 = vpop.eup %1313 }
 0x13a   :  { %v1316_v50 = vpop.eup %1315 }
 0x13c   :  { %1276 = vset.pattern.permute.xlu1 %v1339_v28 }
 0x13d   :  { %1278 = vset.pattern.permute.xlu0 %v1341_v8  ;;  %694 = vperm.xlu1 %1276, %v1310_v47  }
 0x13e   :  { %706 = vperm.xlu0 %1278, %v1310_v47  }
 0x141   :  { %914 = vperm.xlu1 %1276, %v1312_v48  }
 0x142   :  { %1279 = vset.pattern.permute.xlu0 %v1340_v29 }
 0x143   :  { %677 = vperm.xlu0 %1279, %v1314_v49  }
 0x145   :  { %1281 = vset.pattern.permute.xlu1 %v1340_v29  ;;  %v28_v29 = vld [vmem:[%s1797_s2 + $0x18] sm:$0xff] }
 0x146   :  { %897 = vperm.xlu1 %1281, %v1316_v50   ;;  %v468_v11 = vadd.f32 %v1713_v36, %v28_v29  ;;  %v234_v36 = vadd.f32 %v1703_v31, %v25_v17 }
 0x147   :  { %1280 = vset.pattern.permute.xlu0 %v1339_v28 }
 0x148   :  { %690 = vperm.xlu0 %1280, %v1314_v49  }
 0x14a   :  { %1282 = vset.pattern.permute.xlu1 %v1339_v28  ;;  %v249_v28 = vadd.f32 %v1707_v33, %v28_v29 }
 0x14b   :  { %910 = vperm.xlu1 %1282, %v1316_v50  }
 0x14c   :  { %1284 = vset.pattern.permute.xlu0 %v1341_v8 }
 0x14d   :  { %926 = vperm.xlu0 %1284, %v1312_v48  }
 0x14f   :  { %1283 = vset.pattern.permute.xlu1 %v1341_v8  ;;  %v454_v8 = vadd.f32 %v1705_v32, %v26_v51 }
 0x150   :  { %702 = vperm.xlu1 %1283, %v1314_v49  }
 0x154   :  { %922 = vperm.xlu1 %1283, %v1316_v50  }
 0x188   :  { %v256_v53 = vpop.permute.xlu1 %255  ;;  %v244_v54 = vpop.permute.xlu0 %243 }
 0x189   :  { %v259_v55 = vmul.f32 %v256_v53, %v249_v28  ;;  %v247_v56 = vmul.f32 %v244_v54, %v235_v52  ;;  %v674_v28 = vadd.f32 %v1723_v59, %v26_v51  ;;  %v688_v53 = vadd.f32 %v1731_v6, %v28_v29 }
 0x18b   :  { %v261_v57 = vadd.f32 %v259_v55, %v247_v56  ;;  %v894_v56 = vadd.f32 %v1725_v60, %v26_v51 }
 0x18c   :  { %v463_v62 = vpop.permute.xlu0 %462 }
 0x18d   :  { %v268_v58 = vpop.permute.xlu1 %267  ;;  %v466_v14 = vmul.f32 %v463_v62, %v454_v8 }
 0x18e   :  { %v271_v61 = vmul.f32 %v268_v58, %v1378_v0  ;;  %v27_v0 = vld [vmem:[%s1797_s2 + $0x10] sm:$0xff]  ;;  %s1342_s2 = smov [#allocation2]  }
 0x18f   :  { %v248_v19 = vadd.f32 %v1711_v35, %v27_v0  ;;  %s943_s7 = sshll.u32 %s1342_s2, 4  ;;  %s944_s7 = int_to_ptr.vmem [resolvable:$true] %s943_s7 }
 0x190   :  { %v273_v5 = vadd.f32 %v271_v61, %v261_v57  ;;  %v239_v15 = vpop.permute.xlu0 %238  ;;  %v908_v57 = vadd.f32 %v1733_v7, %v28_v29  ;;  %v893_v7 = vadd.f32 %v1729_v4, %v25_v17  ;;  %s1317_s8 = scalar_lea.vmem %s944_s7, 1024  ;;  %p1322_p1 = scmp.lt.s32.totalorder %s944_s7, %s944_s7 }
 0x191   :  { %v246_v23 = vmul.f32 %v239_v15, %v234_v36  ;;  %p1318_p0 = scmp.ne.s32.totalorder %s944_s7, %s1317_s8  ;;  %p1323_p2 = scmp.lt.s32.totalorder %s1317_s8, %s1317_s8 }
 0x192   :  { %v275_v12 = vmax.f32 %v273_v5, 0.0  ;;  %v475_v13 = vpop.permute.xlu1 %474 }
 0x193   :  { %v478_v30 = vmul.f32 %v475_v13, %v468_v11  ;;  %v673_v13 = vadd.f32 %v1727_v63, %v25_v17  ;;  %p1324_p3 = por %p1323_p2, %p1322_p1 }
 0x194   :  { %277 = vst [vmem:[#allocation2 + $0x8] sm:$0xff] %v275_v12 }
 0x195   :  { %v480_v33 = vadd.f32 %v478_v30, %v466_v14  ;;  %v264_v20 = vpop.permute.xlu0 %263  ;;  %v687_v14 = vadd.f32 %v1738_v10, %v27_v0  ;;  %p1325_p4 = pnand %p1324_p3, %p1318_p0 }
 0x196   :  { %v270_v39 = vmul.f32 %v264_v20, %v1388_v2 }
 0x197   :  { %v487_v16 = vpop.permute.xlu1 %486 }
 0x198   :  { %v490_v32 = vmul.f32 %v1383_v1, %v487_v16  ;;  %v467_v1 = vadd.f32 %v1718_v38, %v27_v0 }
 0x199   :  { %v483_v31 = vpop.permute.xlu0 %482 }
 0x19a   :  { %v492_v18 = vadd.f32 %v490_v32, %v480_v33  ;;  %v489_v47 = vmul.f32 %v1395_v3, %v483_v31 }
 0x19c   :  { %v494_v21 = vmax.f32 %v492_v18, 0.0  ;;  %v252_v22 = vpop.permute.xlu1 %251 }
 0x19d   :  { %v258_v37 = vmul.f32 %v252_v22, %v248_v19 }
 0x19e   :  { %497 = vst [vmem:[#allocation2 + $0x18] sm:$0xff] %v494_v21 }
 0x19f   :  { %v260_v41 = vadd.f32 %v258_v37, %v246_v23 }
 0x1a1   :  { %v272_v42 = vadd.f32 %v270_v39, %v260_v41  ;;  %v458_v43 = vpop.permute.xlu1 %457 }
 0x1a2   :  { %v465_v35 = vmul.f32 %v458_v43, %v453_v44 }
 0x1a3   :  { %v274_v40 = vmax.f32 %v272_v42, 0.0 }
 0x1a5   :  { %276 = vst [vmem:[#allocation2] sm:$0xff] %v274_v40 }
 0x1a6   :  { %v471_v45 = vpop.permute.xlu1 %470 }
 0x1a7   :  { %v477_v46 = vmul.f32 %v471_v45, %v467_v1 }
 0x1a9   :  { %v479_v48 = vadd.f32 %v477_v46, %v465_v35 }
 0x1ab   :  { %v491_v49 = vadd.f32 %v489_v47, %v479_v48 }
 0x1ad   :  { %v493_v50 = vmax.f32 %v491_v49, 0.0 }
 0x1af   :  { %496 = vst [vmem:[#allocation2 + $0x10] sm:$0xff] %v493_v50 }
 0x1b3   :  { %v683_v2 = vpop.permute.xlu1 %682 }
 0x1b4   :  { %v903_v52 = vpop.permute.xlu0 %902  ;;  %v686_v54 = vmul.f32 %v683_v2, %v674_v28 }
 0x1b5   :  { %v906_v62 = vmul.f32 %v903_v52, %v894_v56 }
 0x1b8   :  { %v695_v34 = vpop.permute.xlu1 %694 }
 0x1b9   :  { %v698_v38 = vmul.f32 %v695_v34, %v688_v53  ;;  %v707_v55 = vpop.permute.xlu0 %706 }
 0x1ba   :  { %v710_v3 = vmul.f32 %v1584_v24, %v707_v55  ;;  %v907_v24 = vadd.f32 %v1736_v9, %v27_v0 }
 0x1bb   :  { %v700_v58 = vadd.f32 %v698_v38, %v686_v54 }
 0x1bc   :  { %v915_v61 = vpop.permute.xlu1 %914 }
 0x1bd   :  { %v712_v5 = vadd.f32 %v710_v3, %v700_v58  ;;  %v918_v8 = vmul.f32 %v915_v61, %v908_v57 }
 0x1be   :  { %v678_v11 = vpop.permute.xlu0 %677 }
 0x1bf   :  { %v714_v12 = vmax.f32 %v712_v5, 0.0  ;;  %v920_v59 = vadd.f32 %v918_v8, %v906_v62  ;;  %v685_v60 = vmul.f32 %v678_v11, %v673_v13 }
 0x1c1   :  { %717 = vst [vmem:[#allocation2 + $0x28] sm:$0xff] %v714_v12  ;;  %v898_v6 = vpop.permute.xlu1 %897 }
 0x1c2   :  { %v905_v15 = vmul.f32 %v898_v6, %v893_v7 }
 0x1c3   :  { %v691_v30 = vpop.permute.xlu0 %690 }
 0x1c4   :  { %v697_v51 = vmul.f32 %v691_v30, %v687_v14 }
 0x1c6   :  { %v699_v29 = vadd.f32 %v697_v51, %v685_v60  ;;  %v911_v33 = vpop.permute.xlu1 %910 }
 0x1c7   :  { %v917_v16 = vmul.f32 %v911_v33, %v907_v24 }
 0x1c8   :  { %v927_v32 = vpop.permute.xlu0 %926 }
 0x1c9   :  { %v919_v18 = vadd.f32 %v917_v16, %v905_v15  ;;  %v930_v36 = vmul.f32 %v1591_v25, %v927_v32 }
 0x1cb   :  { %v932_v19 = vadd.f32 %v930_v36, %v920_v59  ;;  %v703_v20 = vpop.permute.xlu1 %702 }
 0x1cc   :  { %v709_v63 = vmul.f32 %v1600_v26, %v703_v20 }
 0x1cd   :  { %v934_v10 = vmax.f32 %v932_v19, 0.0 }
 0x1ce   :  { %v711_v21 = vadd.f32 %v709_v63, %v699_v29 }
 0x1cf   :  { %937 = vst [vmem:[#allocation2 + $0x38] sm:$0xff] %v934_v10  ;;  %v923_v22 = vpop.permute.xlu1 %922 }
 0x1d0   :  { %v713_v23 = vmax.f32 %v711_v21, 0.0  ;;  %v929_v4 = vmul.f32 %v1605_v27, %v923_v22 }
 0x1d2   :  { %716 = vst [vmem:[#allocation2 + $0x20] sm:$0xff] %v713_v23  ;;  %v931_v9 = vadd.f32 %v929_v4, %v919_v18 }
 0x1d4   :  { %v933_v17 = vmax.f32 %v931_v9, 0.0 }
 0x1d6   :  { %936 = vst [vmem:[#allocation2 + $0x30] sm:$0xff] %v933_v17 }
 0x1d7   :  { %1328 = shalt.err (!%p1325_p4)
}
 0x1d8   :  { %s1343_s9 = smov 128   ;;  %s1344_s10 = smov 8  }
 0x1d9   :  { %949 = dma.vmem_to_hbm [thread:$0]  %s944_s7, 1024, %s1800_s5, [#allocation3], %s1343_s9, %s1343_s9, %s1344_s10  }
 0x1da   :  { %1337 = dma.done.wait [#allocation3], 1024  }
 0x1db   :  { %1338 = vsyncadd [#allocation3], 4294966272 }
 0x1dc   :  { %953 = vsyncpa [#allocation3], 1 }

</bundles_post_ra>
